<compile_context>
chip_gen: v5e
topology: v5e:2x2
jax: 0.10.0
libtpu: 0.0.40
codegen_flags: <defaults>
</compile_context>

<pallas_src>
import functools

import jax
import jax.numpy as jnp
import numpy as np
from jax.experimental import pallas as pl
from jax.experimental.pallas import tpu as pltpu


def _fold_rows_to_8(a):
    """(..., rows, 128) -> (..., 8, 128) by summing 8-row groups (VPU adds only)."""
    rows = a.shape[-2]
    acc = a[..., 0:8, :]
    for r in range(8, rows, 8):
        acc = acc + a[..., r:r + 8, :]
    return acc


def _dice_ce_kernel(pred_ref, tgt_ref, inter_ref, psum_ref, ysum_ref, ce_ref,
                    *, s_valid, block_rows, total_blocks, steps_per_core,
                    has_tail, has_phantom):
    p = pl.program_id(0)            # parallel axis (megacore split on v7x)
    i = pl.program_id(1)            # streaming / reduction axis
    g = p * steps_per_core + i      # global row-block index

    # Zero this core's partial-sum outputs at the start of its pass.
    @pl.when(i == 0)
    def _init():
        inter_ref[...] = jnp.zeros_like(inter_ref)
        psum_ref[...] = jnp.zeros_like(psum_ref)
        ysum_ref[...] = jnp.zeros_like(ysum_ref)
        ce_ref[...] = jnp.zeros_like(ce_ref)

    def body(masked):
        x = pred_ref[...].astype(jnp.float32)            # (B, N, br, 128)
        tgt = tgt_ref[...].astype(jnp.int32)             # (B, br, 128)
        B, N, br = x.shape[0], x.shape[1], x.shape[2]

        if masked:   # static: only traced for the tail tile's pl.when branch
            row = jax.lax.broadcasted_iota(jnp.int32, tgt.shape, 1)
            lane = jax.lax.broadcasted_iota(jnp.int32, tgt.shape, 2)
            pos = (g * block_rows + row) * 128 + lane
            valid = pos < s_valid                        # (B, br, 128)
            maskf = valid.astype(jnp.float32)
            # Mask logits BEFORE exp so out-of-bounds garbage can't yield NaN/inf.
            x = jnp.where(valid[:, None], x, 0.0)

        # Channel-first one-hot; channel axis (1) is a major axis, so one-hot and
        # all channel reductions below are full-vreg VPU ops (no sublane waste).
        ch = jax.lax.broadcasted_iota(jnp.int32, x.shape, 1)
        y = (ch == tgt[:, None]).astype(jnp.float32)     # (B, N, br, 128)

        m = jnp.max(x, axis=1, keepdims=True)            # (B, 1, br, 128)
        e = jnp.exp(x - m)                               # EUP
        se = jnp.sum(e, axis=1, keepdims=True)
        inv = pl.reciprocal(se, approx=True)             # EUP rcp
        inv = inv * (2.0 - se * inv)                     # one Newton step
        probs = e * inv                                  # softmax(x, dim=1)

        x_tgt = jnp.sum(y * x, axis=1, keepdims=True)    # logit of target class
        ce = jnp.log(se) + m - x_tgt                     # per-voxel cross entropy

        if masked:
            probs = probs * maskf[:, None]
            y = y * maskf[:, None]
            ce = ce * maskf[:, None]

        inter = probs * y

        if block_rows % 8 == 0:
            # Lane-dense accumulation: fold 8-row groups with VPU adds; the one
            # cross-lane reduce happens in the wrapper, once.
            inter_ref[...] += _fold_rows_to_8(inter)
            psum_ref[...] += _fold_rows_to_8(probs)
            ysum_ref[...] += _fold_rows_to_8(y)
            ce_ref[...] += _fold_rows_to_8(ce)[:, 0]
        else:
            # Only reachable for tiny single-block volumes (block_rows == R not a
            # multiple of 8); a one-off XLU reduce is irrelevant there.
            inter_ref[:, :, 0:1, :] += jnp.sum(inter, axis=2, keepdims=True)
            psum_ref[:, :, 0:1, :] += jnp.sum(probs, axis=2, keepdims=True)
            ysum_ref[:, :, 0:1, :] += jnp.sum(y, axis=2, keepdims=True)
            ce_ref[:, 0:1, :] += jnp.sum(ce, axis=2)

    if has_tail:
        @pl.when(g == total_blocks - 1)
        def _tail():
            body(True)

        @pl.when(g < total_blocks - 1)
        def _full():
            body(False)
    elif has_phantom:
        @pl.when(g < total_blocks)
        def _full():
            body(False)
    else:
        body(False)


@functools.partial(jax.jit,
                   static_argnames=("epsilon", "num_parallel", "vmem_budget_bytes"))
def dice_ce_loss(pred, target, *, epsilon=1e-6, num_parallel=2,
                 vmem_budget_bytes=24 * 1024 * 1024):
    """pred: (B, N, *spatial) logits (f32/bf16); target: (B, *spatial) class ids."""
    B, N = int(pred.shape[0]), int(pred.shape[1])
    S = int(np.prod(pred.shape[2:]))

    # ---- layout: lane-major (B, N, R, 128) split of the flattened spatial axis.
    R = (S + 127) // 128
    s128 = R * 128
    tgt_dtype = jnp.int8 if N <= 127 else jnp.int32      # shrink target HBM traffic
    pred3 = pred.reshape(B, N, S)                         # free (row-major)
    tgt2 = target.reshape(B, S).astype(tgt_dtype)
    if s128 != S:
        # Only a pad to the next 128-lane multiple (<=127 voxels); the tile tail
        # is handled in-kernel, so there is NO pad to the tile multiple.
        # TODO(synk): a 3-D fallback layout would avoid even this copy for
        #             non-128-aligned volumes.
        pred3 = jnp.pad(pred3, ((0, 0), (0, 0), (0, s128 - S)))
        tgt2 = jnp.pad(tgt2, ((0, 0), (0, s128 - S)))
    pred4 = pred3.reshape(B, N, R, 128)                   # free
    tgt3 = tgt2.reshape(B, R, 128)                        # free

    # ---- tile rows from the VMEM budget (double-buffered inputs + live f32
    #      intermediates: logits, one-hot, exp, probs, plus per-voxel temps).
    itemsize = int(np.dtype(pred.dtype).itemsize)
    t_item = int(np.dtype(tgt_dtype).itemsize)
    bytes_per_row = 128 * (2 * B * N * itemsize          # pred block (x2 buffers)
                           + 2 * B * t_item              # target block (x2 buffers)
                           + 5 * B * N * 4               # x / y / e / probs + slack
                           + 6 * B * 4)                  # max / sum / inv / ce / ...
    br_cap = min(max(8, vmem_budget_bytes // bytes_per_row), 1024)
    if R <= br_cap:
        br = R                       # single block: full extent is always legal
    else:
        br = max(32, (br_cap // 32) * 32)   # 32-row multiple: aligned for f32/bf16/int8
        if br >= R:
            br = R
    total_blocks = (R + br - 1) // br

    P = max(1, int(num_parallel))
    P = min(P, total_blocks)                              # dual-TC split on v7x
    T = (total_blocks + P - 1) // P
    has_tail = (total_blocks * br * 128 != S)
    has_phantom = (P * T != total_blocks)

    kernel = functools.partial(
        _dice_ce_kernel, s_valid=S, block_rows=br, total_blocks=total_blocks,
        steps_per_core=T, has_tail=has_tail, has_phantom=has_phantom)

    last = total_blocks - 1

    def pred_map(p, i):
        return (0, 0, jnp.minimum(p * T + i, last), 0)

    def tgt_map(p, i):
        return (0, jnp.minimum(p * T + i, last), 0)

    def acc_map(p, i):
        return (p, 0, 0, 0)

    def ce_map(p, i):
        return (p, 0, 0)

    acc_shape = jax.ShapeDtypeStruct((P * B, N, 8, 128), jnp.float32)
    ce_shape = jax.ShapeDtypeStruct((P * B, 8, 128), jnp.float32)

    inter_p, psum_p, ysum_p, ce_p = pl.pallas_call(
        kernel,
        out_shape=(acc_shape, acc_shape, acc_shape, ce_shape),
        grid=(P, T),
        in_specs=[
            pl.BlockSpec((B, N, br, 128), pred_map),
            pl.BlockSpec((B, br, 128), tgt_map),
        ],
        out_specs=(
            pl.BlockSpec((B, N, 8, 128), acc_map),
            pl.BlockSpec((B, N, 8, 128), acc_map),
            pl.BlockSpec((B, N, 8, 128), acc_map),
            pl.BlockSpec((B, 8, 128), ce_map),
        ),
        compiler_params=pltpu.CompilerParams(
            dimension_semantics=("parallel", "arbitrary"),
            vmem_limit_bytes=48 * 1024 * 1024),            # fits v7x 64 MiB physical
    )(pred4, tgt3)

    # ---- tiny final combine (per perf review: moved off the kernel).
    inter = 2.0 * jnp.sum(inter_p.reshape(P, B, N, 8, 128), axis=(0, 3, 4))
    sets = (jnp.sum(psum_p.reshape(P, B, N, 8, 128), axis=(0, 3, 4))
            + jnp.sum(ysum_p.reshape(P, B, N, 8, 128), axis=(0, 3, 4)))
    sets = jnp.where(sets == 0.0, inter, sets)
    dice = (inter + epsilon) / (sets + epsilon)
    dice_loss = 1.0 - jnp.mean(dice)
    ce_mean = jnp.sum(ce_p) / float(B * S)
    return 0.5 * (ce_mean + dice_loss)


def reference_loss(pred, target, epsilon=1e-6):
    """Plain-JAX reference mirroring DiceCELoss(multiclass=True).forward."""
    pred = pred.astype(jnp.float32)
    N = pred.shape[1]
    y = jax.nn.one_hot(target, N, axis=1, dtype=jnp.float32)
    logp = jax.nn.log_softmax(pred, axis=1)
    ce = -jnp.mean(jnp.sum(y * logp, axis=1))
    probs = jax.nn.softmax(pred, axis=1)
    sum_ax = tuple(range(2, pred.ndim))
    inter = 2.0 * jnp.sum(probs * y, axis=sum_ax)
    sets = jnp.sum(probs, axis=sum_ax) + jnp.sum(y, axis=sum_ax)
    sets = jnp.where(sets == 0.0, inter, sets)
    dice = (inter + epsilon) / (sets + epsilon)
    dice_loss = 1.0 - jnp.mean(dice)
    return 0.5 * (ce + dice_loss)


if __name__ == "__main__":
    B, N = 2, 4

    # Case 1: 128-aligned volume -> single large tile, no masking.
    kp, kt = jax.random.split(jax.random.PRNGKey(0))
    D, H, W = 16, 16, 16
    pred = jax.random.normal(kp, (B, N, D, H, W), dtype=jnp.float32)
    target = jax.random.randint(kt, (B, D, H, W), 0, N, dtype=jnp.int32)
    loss = jax.block_until_ready(dice_ce_loss(pred, target))
    ref = jax.block_until_ready(reference_loss(pred, target))
    np.testing.assert_allclose(float(loss), float(ref), rtol=1e-5, atol=1e-5)

    # Case 2: non-128-aligned volume -> lane pad + in-kernel tail mask, tiny block.
    kp2, kt2 = jax.random.split(jax.random.PRNGKey(1))
    D2, H2, W2 = 5, 6, 7
    pred2 = jax.random.normal(kp2, (B, N, D2, H2, W2), dtype=jnp.float32)
    target2 = jax.random.randint(kt2, (B, D2, H2, W2), 0, N, dtype=jnp.int32)
    loss2 = jax.block_until_ready(dice_ce_loss(pred2, target2))
    ref2 = jax.block_until_ready(reference_loss(pred2, target2))
    np.testing.assert_allclose(float(loss2), float(ref2), rtol=1e-5, atol=1e-5)

    # Case 3: bf16 logits, multi-block grid, dual-core split, overhanging tail
    # block (small budget forces multiple tiles to exercise those paths).
    kp3, kt3 = jax.random.split(jax.random.PRNGKey(2))
    D3, H3, W3 = 24, 40, 40
    pred_c3 = jax.random.normal(kp3, (B, N, D3, H3, W3), dtype=jnp.bfloat16)
    target_c3 = jax.random.randint(kt3, (B, D3, H3, W3), 0, N, dtype=jnp.int32)
    loss3 = jax.block_until_ready(
        dice_ce_loss(pred_c3, target_c3, vmem_budget_bytes=1 * 1024 * 1024))
    ref3 = jax.block_until_ready(reference_loss(pred_c3, target_c3))
    np.testing.assert_allclose(float(loss3), float(ref3), rtol=1e-4, atol=1e-4)

    print("KERNEL_OK")
</pallas_src>

<mosaic_0001>
module attributes {stable_mosaic.version = 11 : i64} {
  func.func @_dice_ce_kernel(%arg0: i32, %arg1: i32, %arg2: memref<2x4x32x128xf32, #tpu.memory_space<vmem>>, %arg3: memref<2x32x128xi8, #tpu.memory_space<vmem>>, %arg4: memref<2x4x8x128xf32, #tpu.memory_space<vmem>>, %arg5: memref<2x4x8x128xf32, #tpu.memory_space<vmem>>, %arg6: memref<2x4x8x128xf32, #tpu.memory_space<vmem>>, %arg7: memref<2x8x128xf32, #tpu.memory_space<vmem>>) attributes {dimension_semantics = [#tpu.dimension_semantics<parallel>, #tpu.dimension_semantics<arbitrary>], iteration_bounds = array<i64: 1, 1>, scalar_prefetch = 0 : i64, scratch_operands = 0 : i64, tpu.core_type = #tpu.core_type<tc>, window_params = [{transform_indices = @transform_0, window_bounds = array<i64: 2, 4, 32, 128>}, {transform_indices = @transform_1, window_bounds = array<i64: 2, 32, 128>}, {transform_indices = @transform_2, window_bounds = array<i64: 2, 4, 8, 128>}, {transform_indices = @transform_3, window_bounds = array<i64: 2, 4, 8, 128>}, {transform_indices = @transform_4, window_bounds = array<i64: 2, 4, 8, 128>}, {transform_indices = @transform_5, window_bounds = array<i64: 2, 8, 128>}]} {
    %c0_i32 = arith.constant 0 : i32
    %0 = arith.cmpi eq, %arg1, %c0_i32 : i32
    %1 = arith.extui %0 : i1 to i32
    %c0_i32_0 = arith.constant 0 : i32
    %2 = arith.cmpi ne, %1, %c0_i32_0 : i32
    scf.if %2 {
      %cst_40 = arith.constant 0.000000e+00 : f32
      %74 = vector.broadcast %cst_40 : f32 to vector<2x4x8x128xf32>
      %c0_41 = arith.constant 0 : index
      %c0_42 = arith.constant 0 : index
      %c0_43 = arith.constant 0 : index
      %c0_44 = arith.constant 0 : index
      %75 = vector.load %arg4[%c0_41, %c0_42, %c0_43, %c0_44] : memref<2x4x8x128xf32, #tpu.memory_space<vmem>>, vector<2x4x8x128xf32>
      tpu.vector_store %arg4[%c0_41, %c0_42, %c0_43, %c0_44], %74 {strides = array<i32>} : memref<2x4x8x128xf32, #tpu.memory_space<vmem>>, vector<2x4x8x128xf32>,
      %cst_45 = arith.constant 0.000000e+00 : f32
      %76 = vector.broadcast %cst_45 : f32 to vector<2x4x8x128xf32>
      %c0_46 = arith.constant 0 : index
      %c0_47 = arith.constant 0 : index
      %c0_48 = arith.constant 0 : index
      %c0_49 = arith.constant 0 : index
      %77 = vector.load %arg5[%c0_46, %c0_47, %c0_48, %c0_49] : memref<2x4x8x128xf32, #tpu.memory_space<vmem>>, vector<2x4x8x128xf32>
      tpu.vector_store %arg5[%c0_46, %c0_47, %c0_48, %c0_49], %76 {strides = array<i32>} : memref<2x4x8x128xf32, #tpu.memory_space<vmem>>, vector<2x4x8x128xf32>,
      %cst_50 = arith.constant 0.000000e+00 : f32
      %78 = vector.broadcast %cst_50 : f32 to vector<2x4x8x128xf32>
      %c0_51 = arith.constant 0 : index
      %c0_52 = arith.constant 0 : index
      %c0_53 = arith.constant 0 : index
      %c0_54 = arith.constant 0 : index
      %79 = vector.load %arg6[%c0_51, %c0_52, %c0_53, %c0_54] : memref<2x4x8x128xf32, #tpu.memory_space<vmem>>, vector<2x4x8x128xf32>
      tpu.vector_store %arg6[%c0_51, %c0_52, %c0_53, %c0_54], %78 {strides = array<i32>} : memref<2x4x8x128xf32, #tpu.memory_space<vmem>>, vector<2x4x8x128xf32>,
      %cst_55 = arith.constant 0.000000e+00 : f32
      %80 = vector.broadcast %cst_55 : f32 to vector<2x8x128xf32>
      %c0_56 = arith.constant 0 : index
      %c0_57 = arith.constant 0 : index
      %c0_58 = arith.constant 0 : index
      %81 = vector.load %arg7[%c0_56, %c0_57, %c0_58] : memref<2x8x128xf32, #tpu.memory_space<vmem>>, vector<2x8x128xf32>
      tpu.vector_store %arg7[%c0_56, %c0_57, %c0_58], %80 {strides = array<i32>} : memref<2x8x128xf32, #tpu.memory_space<vmem>>, vector<2x8x128xf32>,
    } else {
    }
    %c0 = arith.constant 0 : index
    %c0_1 = arith.constant 0 : index
    %c0_2 = arith.constant 0 : index
    %c0_3 = arith.constant 0 : index
    %3 = vector.load %arg2[%c0, %c0_1, %c0_2, %c0_3] : memref<2x4x32x128xf32, #tpu.memory_space<vmem>>, vector<2x4x32x128xf32>
    %c0_4 = arith.constant 0 : index
    %c0_5 = arith.constant 0 : index
    %c0_6 = arith.constant 0 : index
    %4 = vector.load %arg3[%c0_4, %c0_5, %c0_6] : memref<2x32x128xi8, #tpu.memory_space<vmem>>, vector<2x32x128xi8>
    %5 = arith.extsi %4 : vector<2x32x128xi8> to vector<2x32x128xi32>
    %6 = tpu.iota {dimensions = array<i32: 1>} : vector<2x4x32x128xi32>
    %7 = vector.shape_cast %5 : vector<2x32x128xi32> to vector<2x1x32x128xi32>
    %8 = vector.broadcast %7 : vector<2x1x32x128xi32> to vector<2x4x32x128xi32>
    %9 = arith.cmpi eq, %6, %8 : vector<2x4x32x128xi32>
    %10 = arith.extui %9 : vector<2x4x32x128xi1> to vector<2x4x32x128xi32>
    %11 = arith.sitofp %10 : vector<2x4x32x128xi32> to vector<2x4x32x128xf32>
    %cst = arith.constant dense<0xFF800000> : vector<2x32x128xf32>
    %12 = vector.multi_reduction <maximumf>, %3, %cst [1] : vector<2x4x32x128xf32> to vector<2x32x128xf32>
    %13 = vector.shape_cast %12 : vector<2x32x128xf32> to vector<2x1x32x128xf32>
    %14 = vector.broadcast %13 : vector<2x1x32x128xf32> to vector<2x4x32x128xf32>
    %15 = arith.subf %3, %14 : vector<2x4x32x128xf32>
    %16 = math.exp %15 : vector<2x4x32x128xf32>
    %cst_7 = arith.constant dense<0.000000e+00> : vector<2x32x128xf32>
    %17 = vector.multi_reduction <add>, %16, %cst_7 [1] : vector<2x4x32x128xf32> to vector<2x32x128xf32>
    %18 = vector.shape_cast %17 : vector<2x32x128xf32> to vector<2x1x32x128xf32>
    %19 = tpu.reciprocal %18 {approx = true} : vector<2x1x32x128xf32> -> vector<2x1x32x128xf32>
    %20 = arith.mulf %18, %19 : vector<2x1x32x128xf32>
    %cst_8 = arith.constant 2.000000e+00 : f32
    %21 = vector.broadcast %cst_8 : f32 to vector<2x1x32x128xf32>
    %22 = arith.subf %21, %20 : vector<2x1x32x128xf32>
    %23 = arith.mulf %19, %22 : vector<2x1x32x128xf32>
    %24 = vector.broadcast %23 : vector<2x1x32x128xf32> to vector<2x4x32x128xf32>
    %25 = arith.mulf %16, %24 : vector<2x4x32x128xf32>
    %26 = arith.mulf %11, %3 : vector<2x4x32x128xf32>
    %cst_9 = arith.constant dense<0.000000e+00> : vector<2x32x128xf32>
    %27 = vector.multi_reduction <add>, %26, %cst_9 [1] : vector<2x4x32x128xf32> to vector<2x32x128xf32>
    %28 = vector.shape_cast %27 : vector<2x32x128xf32> to vector<2x1x32x128xf32>
    %29 = math.log %18 : vector<2x1x32x128xf32>
    %30 = arith.addf %29, %13 : vector<2x1x32x128xf32>
    %31 = arith.subf %30, %28 : vector<2x1x32x128xf32>
    %32 = arith.mulf %25, %11 : vector<2x4x32x128xf32>
    %c0_10 = arith.constant 0 : index
    %c0_11 = arith.constant 0 : index
    %c0_12 = arith.constant 0 : index
    %c0_13 = arith.constant 0 : index
    %33 = vector.load %arg4[%c0_10, %c0_11, %c0_12, %c0_13] : memref<2x4x8x128xf32, #tpu.memory_space<vmem>>, vector<2x4x8x128xf32>
    %34 = vector.extract_strided_slice %32 {offsets = [0, 0, 0, 0], sizes = [2, 4, 8, 128], strides = [1, 1, 1, 1]} : vector<2x4x32x128xf32> to vector<2x4x8x128xf32>
    %35 = vector.extract_strided_slice %32 {offsets = [0, 0, 8, 0], sizes = [2, 4, 8, 128], strides = [1, 1, 1, 1]} : vector<2x4x32x128xf32> to vector<2x4x8x128xf32>
    %36 = arith.addf %34, %35 : vector<2x4x8x128xf32>
    %37 = vector.extract_strided_slice %32 {offsets = [0, 0, 16, 0], sizes = [2, 4, 8, 128], strides = [1, 1, 1, 1]} : vector<2x4x32x128xf32> to vector<2x4x8x128xf32>
    %38 = arith.addf %36, %37 : vector<2x4x8x128xf32>
    %39 = vector.extract_strided_slice %32 {offsets = [0, 0, 24, 0], sizes = [2, 4, 8, 128], strides = [1, 1, 1, 1]} : vector<2x4x32x128xf32> to vector<2x4x8x128xf32>
    %40 = arith.addf %38, %39 : vector<2x4x8x128xf32>
    %41 = arith.addf %33, %40 : vector<2x4x8x128xf32>
    %c0_14 = arith.constant 0 : index
    %c0_15 = arith.constant 0 : index
    %c0_16 = arith.constant 0 : index
    %c0_17 = arith.constant 0 : index
    %42 = vector.load %arg4[%c0_14, %c0_15, %c0_16, %c0_17] : memref<2x4x8x128xf32, #tpu.memory_space<vmem>>, vector<2x4x8x128xf32>
    tpu.vector_store %arg4[%c0_14, %c0_15, %c0_16, %c0_17], %41 {strides = array<i32>} : memref<2x4x8x128xf32, #tpu.memory_space<vmem>>, vector<2x4x8x128xf32>,
    %c0_18 = arith.constant 0 : index
    %c0_19 = arith.constant 0 : index
    %c0_20 = arith.constant 0 : index
    %c0_21 = arith.constant 0 : index
    %43 = vector.load %arg5[%c0_18, %c0_19, %c0_20, %c0_21] : memref<2x4x8x128xf32, #tpu.memory_space<vmem>>, vector<2x4x8x128xf32>
    %44 = vector.extract_strided_slice %25 {offsets = [0, 0, 0, 0], sizes = [2, 4, 8, 128], strides = [1, 1, 1, 1]} : vector<2x4x32x128xf32> to vector<2x4x8x128xf32>
    %45 = vector.extract_strided_slice %25 {offsets = [0, 0, 8, 0], sizes = [2, 4, 8, 128], strides = [1, 1, 1, 1]} : vector<2x4x32x128xf32> to vector<2x4x8x128xf32>
    %46 = arith.addf %44, %45 : vector<2x4x8x128xf32>
    %47 = vector.extract_strided_slice %25 {offsets = [0, 0, 16, 0], sizes = [2, 4, 8, 128], strides = [1, 1, 1, 1]} : vector<2x4x32x128xf32> to vector<2x4x8x128xf32>
    %48 = arith.addf %46, %47 : vector<2x4x8x128xf32>
    %49 = vector.extract_strided_slice %25 {offsets = [0, 0, 24, 0], sizes = [2, 4, 8, 128], strides = [1, 1, 1, 1]} : vector<2x4x32x128xf32> to vector<2x4x8x128xf32>
    %50 = arith.addf %48, %49 : vector<2x4x8x128xf32>
    %51 = arith.addf %43, %50 : vector<2x4x8x128xf32>
    %c0_22 = arith.constant 0 : index
    %c0_23 = arith.constant 0 : index
    %c0_24 = arith.constant 0 : index
    %c0_25 = arith.constant 0 : index
    %52 = vector.load %arg5[%c0_22, %c0_23, %c0_24, %c0_25] : memref<2x4x8x128xf32, #tpu.memory_space<vmem>>, vector<2x4x8x128xf32>
    tpu.vector_store %arg5[%c0_22, %c0_23, %c0_24, %c0_25], %51 {strides = array<i32>} : memref<2x4x8x128xf32, #tpu.memory_space<vmem>>, vector<2x4x8x128xf32>,
    %c0_26 = arith.constant 0 : index
    %c0_27 = arith.constant 0 : index
    %c0_28 = arith.constant 0 : index
    %c0_29 = arith.constant 0 : index
    %53 = vector.load %arg6[%c0_26, %c0_27, %c0_28, %c0_29] : memref<2x4x8x128xf32, #tpu.memory_space<vmem>>, vector<2x4x8x128xf32>
    %54 = vector.extract_strided_slice %11 {offsets = [0, 0, 0, 0], sizes = [2, 4, 8, 128], strides = [1, 1, 1, 1]} : vector<2x4x32x128xf32> to vector<2x4x8x128xf32>
    %55 = vector.extract_strided_slice %11 {offsets = [0, 0, 8, 0], sizes = [2, 4, 8, 128], strides = [1, 1, 1, 1]} : vector<2x4x32x128xf32> to vector<2x4x8x128xf32>
    %56 = arith.addf %54, %55 : vector<2x4x8x128xf32>
    %57 = vector.extract_strided_slice %11 {offsets = [0, 0, 16, 0], sizes = [2, 4, 8, 128], strides = [1, 1, 1, 1]} : vector<2x4x32x128xf32> to vector<2x4x8x128xf32>
    %58 = arith.addf %56, %57 : vector<2x4x8x128xf32>
    %59 = vector.extract_strided_slice %11 {offsets = [0, 0, 24, 0], sizes = [2, 4, 8, 128], strides = [1, 1, 1, 1]} : vector<2x4x32x128xf32> to vector<2x4x8x128xf32>
    %60 = arith.addf %58, %59 : vector<2x4x8x128xf32>
    %61 = arith.addf %53, %60 : vector<2x4x8x128xf32>
    %c0_30 = arith.constant 0 : index
    %c0_31 = arith.constant 0 : index
    %c0_32 = arith.constant 0 : index
    %c0_33 = arith.constant 0 : index
    %62 = vector.load %arg6[%c0_30, %c0_31, %c0_32, %c0_33] : memref<2x4x8x128xf32, #tpu.memory_space<vmem>>, vector<2x4x8x128xf32>
    tpu.vector_store %arg6[%c0_30, %c0_31, %c0_32, %c0_33], %61 {strides = array<i32>} : memref<2x4x8x128xf32, #tpu.memory_space<vmem>>, vector<2x4x8x128xf32>,
    %c0_34 = arith.constant 0 : index
    %c0_35 = arith.constant 0 : index
    %c0_36 = arith.constant 0 : index
    %63 = vector.load %arg7[%c0_34, %c0_35, %c0_36] : memref<2x8x128xf32, #tpu.memory_space<vmem>>, vector<2x8x128xf32>
    %64 = vector.extract_strided_slice %31 {offsets = [0, 0, 0, 0], sizes = [2, 1, 8, 128], strides = [1, 1, 1, 1]} : vector<2x1x32x128xf32> to vector<2x1x8x128xf32>
    %65 = vector.extract_strided_slice %31 {offsets = [0, 0, 8, 0], sizes = [2, 1, 8, 128], strides = [1, 1, 1, 1]} : vector<2x1x32x128xf32> to vector<2x1x8x128xf32>
    %66 = arith.addf %64, %65 : vector<2x1x8x128xf32>
    %67 = vector.extract_strided_slice %31 {offsets = [0, 0, 16, 0], sizes = [2, 1, 8, 128], strides = [1, 1, 1, 1]} : vector<2x1x32x128xf32> to vector<2x1x8x128xf32>
    %68 = arith.addf %66, %67 : vector<2x1x8x128xf32>
    %69 = vector.extract_strided_slice %31 {offsets = [0, 0, 24, 0], sizes = [2, 1, 8, 128], strides = [1, 1, 1, 1]} : vector<2x1x32x128xf32> to vector<2x1x8x128xf32>
    %70 = arith.addf %68, %69 : vector<2x1x8x128xf32>
    %71 = vector.shape_cast %70 : vector<2x1x8x128xf32> to vector<2x8x128xf32>
    %72 = arith.addf %63, %71 : vector<2x8x128xf32>
    %c0_37 = arith.constant 0 : index
    %c0_38 = arith.constant 0 : index
    %c0_39 = arith.constant 0 : index
    %73 = vector.load %arg7[%c0_37, %c0_38, %c0_39] : memref<2x8x128xf32, #tpu.memory_space<vmem>>, vector<2x8x128xf32>
    tpu.vector_store %arg7[%c0_37, %c0_38, %c0_39], %72 {strides = array<i32>} : memref<2x8x128xf32, #tpu.memory_space<vmem>>, vector<2x8x128xf32>,
    return
  }
  func.func @transform_0(%arg0: i32, %arg1: i32) -> (i32, i32, i32, i32) {
    %c1_i32 = arith.constant 1 : i32
    %0 = arith.muli %arg0, %c1_i32 : i32
    %1 = arith.addi %0, %arg1 : i32
    %c0_i32 = arith.constant 0 : i32
    %2 = arith.minsi %1, %c0_i32 : i32
    %c0_i32_0 = arith.constant 0 : i32
    %c0_i32_1 = arith.constant 0 : i32
    %c0_i32_2 = arith.constant 0 : i32
    %c0_i32_3 = arith.constant 0 : i32
    return %c0_i32_0, %c0_i32_1, %2, %c0_i32_2 : i32, i32, i32, i32
  }
  func.func @transform_1(%arg0: i32, %arg1: i32) -> (i32, i32, i32) {
    %c1_i32 = arith.constant 1 : i32
    %0 = arith.muli %arg0, %c1_i32 : i32
    %1 = arith.addi %0, %arg1 : i32
    %c0_i32 = arith.constant 0 : i32
    %2 = arith.minsi %1, %c0_i32 : i32
    %c0_i32_0 = arith.constant 0 : i32
    %c0_i32_1 = arith.constant 0 : i32
    %c0_i32_2 = arith.constant 0 : i32
    return %c0_i32_0, %2, %c0_i32_1 : i32, i32, i32
  }
  func.func @transform_2(%arg0: i32, %arg1: i32) -> (i32, i32, i32, i32) {
    %c0_i32 = arith.constant 0 : i32
    %c0_i32_0 = arith.constant 0 : i32
    %c0_i32_1 = arith.constant 0 : i32
    %c0_i32_2 = arith.constant 0 : i32
    return %arg0, %c0_i32, %c0_i32_0, %c0_i32_1 : i32, i32, i32, i32
  }
  func.func @transform_3(%arg0: i32, %arg1: i32) -> (i32, i32, i32, i32) {
    %c0_i32 = arith.constant 0 : i32
    %c0_i32_0 = arith.constant 0 : i32
    %c0_i32_1 = arith.constant 0 : i32
    %c0_i32_2 = arith.constant 0 : i32
    return %arg0, %c0_i32, %c0_i32_0, %c0_i32_1 : i32, i32, i32, i32
  }
  func.func @transform_4(%arg0: i32, %arg1: i32) -> (i32, i32, i32, i32) {
    %c0_i32 = arith.constant 0 : i32
    %c0_i32_0 = arith.constant 0 : i32
    %c0_i32_1 = arith.constant 0 : i32
    %c0_i32_2 = arith.constant 0 : i32
    return %arg0, %c0_i32, %c0_i32_0, %c0_i32_1 : i32, i32, i32, i32
  }
  func.func @transform_5(%arg0: i32, %arg1: i32) -> (i32, i32, i32) {
    %c0_i32 = arith.constant 0 : i32
    %c0_i32_0 = arith.constant 0 : i32
    %c0_i32_1 = arith.constant 0 : i32
    return %arg0, %c0_i32, %c0_i32_0 : i32, i32, i32
  }
}

</mosaic_0001>

<bundles_post_ra>
// kernel: dice_ce_loss.1
= control target key start
LH: loop header
LB: loop body
LE: loop exit
PB: predicated region body
PF: predicated region fallthrough
CT: control target
= control target key end

     0   :  { %v1914_v36 = vmov 0.0   ;;  %s1908_s0 = inlined_call_operand.vmem [shape: f32[2,4,32,128], index: 0, kind: input, shape index: {}]   ;;  %s1909_s1 = inlined_call_operand.vmem [shape: s8[2,32,128], index: 1, kind: input, shape index: {}]   ;;  %s1910_s2 = inlined_call_operand.vmem [shape: f32[2,4,8,128], index: 2, kind: output, shape index: {0}]   ;;  %s1911_s3 = inlined_call_operand.vmem [shape: f32[2,4,8,128], index: 3, kind: output, shape index: {1}]   ;;  %s1912_s4 = inlined_call_operand.vmem [shape: f32[2,4,8,128], index: 4, kind: output, shape index: {2}]   ;;  %s1913_s5 = inlined_call_operand.vmem [shape: f32[2,8,128], index: 5, kind: output, shape index: {3}]  }
   0x1   :  { %v917_v0 = vld [vmem:[%s1908_s0] sm:$0xff]  ;;  %v922_v1 = vld [vmem:[%s1908_s0 + $0x8] sm:$0xff]  ;;  %v927_v2 = vld [vmem:[%s1908_s0 + $0x10] sm:$0xff] }
   0x2   :  { %v932_v3 = vld [vmem:[%s1908_s0 + $0x18] sm:$0xff]  ;;  %v937_v4 = vld [vmem:[%s1908_s0 + $0x20] sm:$0xff]  ;;  %v942_v5 = vld [vmem:[%s1908_s0 + $0x28] sm:$0xff] }
   0x3   :  { %v947_v6 = vld [vmem:[%s1908_s0 + $0x30] sm:$0xff]  ;;  %v952_v7 = vld [vmem:[%s1908_s0 + $0x38] sm:$0xff]  ;;  %v957_v8 = vld [vmem:[%s1908_s0 + $0x40] sm:$0xff]  ;;  %v242_v9 = vmax.f32 %v917_v0, %v937_v4  ;;  %v245_v10 = vmax.f32 %v922_v1, %v942_v5 }
   0x4   :  { %v966_v11 = vld [vmem:[%s1908_s0 + $0x48] sm:$0xff]  ;;  %v971_v12 = vld [vmem:[%s1908_s0 + $0x50] sm:$0xff]  ;;  %v976_v13 = vld [vmem:[%s1908_s0 + $0x58] sm:$0xff]  ;;  %v248_v14 = vmax.f32 %v927_v2, %v947_v6  ;;  %v251_v15 = vmax.f32 %v932_v3, %v952_v7 }
   0x5   :  { %v985_v16 = vld [vmem:[%s1908_s0 + $0x60] sm:$0xff]  ;;  %v990_v17 = vld [vmem:[%s1908_s0 + $0x68] sm:$0xff]  ;;  %v995_v18 = vld [vmem:[%s1908_s0 + $0x70] sm:$0xff]  ;;  %v243_v19 = vmax.f32 %v242_v9, %v957_v8  ;;  %v246_v20 = vmax.f32 %v245_v10, %v966_v11 }
   0x6   :  { %1976 = vst [vmem:[#allocation2_spill] sm:$0xff] %v985_v16  ;;  %v1002_v21 = vld [vmem:[%s1908_s0 + $0x78] sm:$0xff]  ;;  %v136_v22 = vld [vmem:[%s1909_s1] sm:$0xff]  ;;  %v249_v23 = vmax.f32 %v248_v14, %v971_v12  ;;  %v252_v24 = vmax.f32 %v251_v15, %v976_v13 }
   0x7   :  { %1977 = vst [vmem:[#allocation3_spill] sm:$0xff] %v990_v17  ;;  %v1009_v25 = vunpack.c.0.s8 %v136_v22  ;;  %v1012_v26 = vmax.f32 %v243_v19, %v985_v16  ;;  %v1015_v27 = vmax.f32 %v246_v20, %v990_v17  ;;  %v1024_v30 = vunpack.c.1.s8 %v136_v22 }
   0x8   :  { %1978 = vst [vmem:[#allocation4_spill] sm:$0xff] %v995_v18  ;;  %v1018_v28 = vmax.f32 %v249_v23, %v995_v18  ;;  %v1021_v29 = vmax.f32 %v252_v24, %v1002_v21  ;;  %v1032_v34 = vunpack.c.2.s8 %v136_v22  ;;  %v1034_v35 = vunpack.c.3.s8 %v136_v22 }
   0x9   :  { %1979 = vst [vmem:[#allocation5_spill] sm:$0xff] %v1002_v21  ;;  %vm146_vm0 = vcmp.eq.s32.totalorder %v1009_v25, 0  ;;  %v266_v31 = vsub.f32 %v917_v0, %v1012_v26  ;;  %v267_v32 = vsub.f32 %v922_v1, %v1015_v27  ;;  %v270_v39 = vsub.f32 %v937_v4, %v1012_v26 }
   0xa   :  { %1980 = vst [vmem:[#allocation6_spill] sm:$0xff] %v1012_v26  ;;  %v268_v33 = vsub.f32 %v927_v2, %v1018_v28  ;;  %v1037_v37 = vsel %vm146_vm0, 1.0, %v1914_v36  ;;  %v269_v38 = vsub.f32 %v932_v3, %v1021_v29  ;;  %v271_v40 = vsub.f32 %v942_v5, %v1015_v27 }
   0xb   :  { %1981 = vst [vmem:[#allocation7_spill] sm:$0xff] %v1015_v27  ;;  %v272_v41 = vsub.f32 %v947_v6, %v1018_v28  ;;  %v273_v42 = vsub.f32 %v952_v7, %v1021_v29  ;;  %v274_v43 = vsub.f32 %v957_v8, %v1012_v26  ;;  %v275_v44 = vsub.f32 %v966_v11, %v1015_v27 }
   0xc   :  { %1982 = vst [vmem:[#allocation8_spill] sm:$0xff] %v1018_v28  ;;  %v276_v45 = vsub.f32 %v971_v12, %v1018_v28  ;;  %v277_v46 = vsub.f32 %v976_v13, %v1021_v29  ;;  %v278_v47 = vsub.f32 %v985_v16, %v1012_v26  ;;  %v298_v48 = vmul.f32 1.442695, %v266_v31 }
   0xd   :  { %1983 = vst [vmem:[#allocation9_spill] sm:$0xff] %v1021_v29  ;;  %v300_v49 = vmul.f32 1.442695, %v267_v32  ;;  %v302_v50 = vmul.f32 1.442695, %v268_v33  ;;  %v279_v51 = vsub.f32 %v990_v17, %v1015_v27  ;;  %v280_v52 = vsub.f32 %v995_v18, %v1018_v28  ;;  %v1247_v27 = vld [vmem:[%s1908_s0 + $0xc0] sm:$0xff] }
   0xe   :  { %v281_v53 = vsub.f32 %v1002_v21, %v1021_v29  ;;  %v304_v54 = vmul.f32 1.442695, %v269_v38  ;;  %787 = vpow2.f32 %v298_v48  ;;  %v306_v55 = vmul.f32 1.442695, %v270_v39  ;;  %2006 = vst [vmem:[#allocation31_spill] sm:$0xff] %v1247_v27  ;;  %v1340_v17 = vld [vmem:[%s1908_s0 + $0xf0] sm:$0xff] }
   0xf   :  { %v308_v56 = vmul.f32 1.442695, %v271_v40  ;;  %v310_v57 = vmul.f32 1.442695, %v272_v41  ;;  %vm147_vm1 = vcmp.eq.s32.totalorder %v1024_v30, 0  ;;  %789 = vpow2.f32 %v300_v49  ;;  %2021 = vst [vmem:[#allocation46_spill] sm:$0xff] %v1340_v17 }
  0x10   :  { %v312_v58 = vmul.f32 1.442695, %v273_v42  ;;  %v314_v59 = vmul.f32 1.442695, %v274_v43  ;;  %v316_v60 = vmul.f32 1.442695, %v275_v44  ;;  %791 = vpow2.f32 %v302_v50 }
  0x11   :  { %vm148_vm2 = vcmp.eq.s32.totalorder %v1032_v34, 0  ;;  %vm149_vm3 = vcmp.eq.s32.totalorder %v1034_v35, 0  ;;  %v318_v61 = vmul.f32 1.442695, %v276_v45  ;;  %v320_v62 = vmul.f32 1.442695, %v277_v46 }
  0x12   :  { %v322_v63 = vmul.f32 1.442695, %v278_v47  ;;  %793 = vpow2.f32 %v304_v54  ;;  %v324_v9 = vmul.f32 1.442695, %v279_v51  ;;  %v326_v10 = vmul.f32 1.442695, %v280_v52 }
  0x13   :  { %v328_v14 = vmul.f32 1.442695, %v281_v53  ;;  %795 = vpow2.f32 %v306_v55  ;;  %vm150_vm4 = vcmp.eq.s32.totalorder %v1009_v25, 1  ;;  %vm151_vm5 = vcmp.eq.s32.totalorder %v1024_v30, 1  ;;  %v1184_v55 = vld [vmem:[%s1908_s0 + $0x80] sm:$0xff] }
  0x14   :  { %vm152_vm6 = vcmp.eq.s32.totalorder %v1032_v34, 1  ;;  %797 = vpow2.f32 %v308_v56  ;;  %vm153_vm7 = vcmp.eq.s32.totalorder %v1034_v35, 1  ;;  %v1073_v15 = vsel %vm150_vm4, 1.0, %v1914_v36  ;;  %v1078_v20 = vpop.eup %787  ;;  %1996 = vst [vmem:[#allocation22_spill] sm:$0xff] %v1184_v55  ;;  %v1189_v56 = vld [vmem:[%s1908_s0 + $0xa0] sm:$0xff] }
  0x15   :  { %v1076_v19 = vsel %vm151_vm5, 1.0, %v1914_v36  ;;  %799 = vpow2.f32 %v310_v57  ;;  %v1081_v22 = vsel %vm152_vm6, 1.0, %v1914_v36  ;;  %v1084_v23 = vsel %vm153_vm7, 1.0, %v1914_v36  ;;  %v1090_v31 = vpop.eup %789  ;;  %1997 = vst [vmem:[#allocation23_spill] sm:$0xff] %v1189_v56 }
  0x16   :  { %1984 = vst [vmem:[#allocation10_spill] sm:$0xff] %v1084_v23  ;;  %v1088_v24 = vmul.f32 %v1073_v15, %v937_v4  ;;  %801 = vpow2.f32 %v312_v58  ;;  %v1094_v32 = vmul.f32 %v1076_v19, %v942_v5  ;;  %v1098_v33 = vmul.f32 %v1081_v22, %v947_v6  ;;  %v1104_v39 = vpop.eup %791 }
  0x17   :  { %v1102_v38 = vmul.f32 %v1084_v23, %v952_v7  ;;  %803 = vpow2.f32 %v314_v59  ;;  %vm154_vm8 = vcmp.eq.s32.totalorder %v1009_v25, 2  ;;  %vm155_vm9 = vcmp.eq.s32.totalorder %v1024_v30, 2  ;;  %v1204_v59 = vld [vmem:[%s1908_s0 + $0xa8] sm:$0xff] }
  0x18   :  { %1985 = vst [vmem:[#allocation11_spill] sm:$0xff] %v1088_v24  ;;  %vm156_vm10 = vcmp.eq.s32.totalorder %v1032_v34, 2  ;;  %v1109_v4 = vpop.eup %793  ;;  %805 = vpow2.f32 %v316_v60  ;;  %vm157_vm11 = vcmp.eq.s32.totalorder %v1034_v35, 2  ;;  %v1113_v5 = vsel %vm154_vm8, 1.0, %v1914_v36 }
  0x19   :  { %1986 = vst [vmem:[#allocation12_spill] sm:$0xff] %v1094_v32  ;;  %v1116_v6 = vsel %vm155_vm9, 1.0, %v1914_v36  ;;  %v1118_v7 = vpop.eup %795  ;;  %807 = vpow2.f32 %v318_v61  ;;  %v1121_v40 = vsel %vm156_vm10, 1.0, %v1914_v36  ;;  %v1124_v41 = vsel %vm157_vm11, 1.0, %v1914_v36  ;;  %v1319_v32 = vld [vmem:[%s1908_s0 + $0xd0] sm:$0xff] }
  0x1a   :  { %1987 = vst [vmem:[#allocation13_spill] sm:$0xff] %v1098_v33  ;;  %v1128_v42 = vmul.f32 %v1113_v5, %v957_v8  ;;  %v1130_v43 = vpop.eup %797  ;;  %809 = vpow2.f32 %v320_v62  ;;  %v362_v44 = vadd.f32 %v1118_v7, %v1078_v20  ;;  %v1136_v45 = vmul.f32 %v1116_v6, %v966_v11 }
  0x1b   :  { %1988 = vst [vmem:[#allocation14_spill] sm:$0xff] %v1102_v38  ;;  %v1140_v46 = vmul.f32 %v1121_v40, %v971_v12  ;;  %v1142_v47 = vpop.eup %799  ;;  %v1147_v8 = vsel %vm147_vm1, 1.0, %v1914_v36  ;;  %811 = vpow2.f32 %v322_v63  ;;  %v365_v48 = vadd.f32 %v1130_v43, %v1090_v31  ;;  %v1299_v38 = vld [vmem:[%s1908_s0 + $0xe0] sm:$0xff] }
  0x1c   :  { %1989 = vst [vmem:[#allocation15_spill] sm:$0xff] %v1124_v41  ;;  %v1153_v49 = vmul.f32 %v1124_v41, %v976_v13  ;;  %v1155_v11 = vpop.eup %801  ;;  %v1160_v12 = vsel %vm148_vm2, 1.0, %v1914_v36  ;;  %v1165_v50 = vsel %vm149_vm3, 1.0, %v1914_v36  ;;  %813 = vpow2.f32 %v324_v9  ;;  %v137_v13 = vld [vmem:[%s1909_s1 + $0x8] sm:$0xff] }
  0x1d   :  { %1990 = vst [vmem:[#allocation16_spill] sm:$0xff] %v1128_v42  ;;  %v368_v51 = vadd.f32 %v1142_v47, %v1104_v39  ;;  %v1172_v52 = vpop.eup %803  ;;  %815 = vpow2.f32 %v326_v10  ;;  %v371_v53 = vadd.f32 %v1155_v11, %v1109_v4  ;;  %v1178_v54 = vmul.f32 %v1037_v37, %v917_v0  ;;  %v1199_v0 = vld [vmem:[%s1908_s0 + $0x88] sm:$0xff] }
  0x1e   :  { %1991 = vst [vmem:[#allocation17_spill] sm:$0xff] %v1136_v45  ;;  %vm158_vm12 = vcmp.eq.s32.totalorder %v1009_v25, 3  ;;  %v1191_v57 = vpop.eup %805  ;;  %817 = vpow2.f32 %v328_v14  ;;  %v363_v58 = vadd.f32 %v1172_v52, %v362_v44  ;;  %vm159_vm13 = vcmp.eq.s32.totalorder %v1024_v30, 3  ;;  %v1284_v30 = vld [vmem:[%s1908_s0 + $0xb0] sm:$0xff] }
  0x1f   :  { %1992 = vst [vmem:[#allocation18_spill] sm:$0xff] %v1140_v46  ;;  %vm160_vm14 = vcmp.eq.s32.totalorder %v1032_v34, 3  ;;  %v1206_v60 = vpop.eup %807  ;;  %v366_v61 = vadd.f32 %v1191_v57, %v365_v48  ;;  %vm161_vm15 = vcmp.eq.s32.totalorder %v1034_v35, 3  ;;  %v1210_v62 = vunpack.c.0.s8 %v137_v13  ;;  %v1289_v34 = vld [vmem:[%s1908_s0 + $0xb8] sm:$0xff] }
  0x20   :  { %1993 = vst [vmem:[#allocation19_spill] sm:$0xff] %v1153_v49  ;;  %v1212_v63 = vunpack.c.1.s8 %v137_v13  ;;  %v1214_v9 = vpop.eup %809  ;;  %v369_v10 = vadd.f32 %v1206_v60, %v368_v51  ;;  %v1219_v14 = vmul.f32 %v1147_v8, %v922_v1  ;;  %v1223_v44 = vmul.f32 %v1160_v12, %v927_v2  ;;  %v1242_v2 = vld [vmem:[%s1908_s0 + $0x90] sm:$0xff] }
  0x21   :  { %1994 = vst [vmem:[#allocation20_spill] sm:$0xff] %v1165_v50  ;;  %v254_v48 = vmax.f32 %v1184_v55, %v1189_v56  ;;  %v1227_v36 = vpop.eup %811  ;;  %v372_v29 = vadd.f32 %v1214_v9, %v371_v53  ;;  %v1232_v28 = vmul.f32 %v1165_v50, %v932_v3  ;;  %v2004_v51 = vmov 0.0   ;;  %v1252_v3 = vld [vmem:[%s1908_s0 + $0xc8] sm:$0xff] }
  0x22   :  { %1995 = vst [vmem:[#allocation21_spill] sm:$0xff] %v1178_v54  ;;  %v1237_v1 = vsel %vm158_vm12, 1.0, %v2004_v51  ;;  %v257_v25 = vmax.f32 %v1199_v0, %v1204_v59  ;;  %v1256_v53 = vpop.eup %813  ;;  %v1259_v26 = vadd.f32 %v1227_v36, %v363_v58  ;;  %v1264_v49 = vsel %vm159_vm13, 1.0, %v2004_v51  ;;  %v1279_v58 = vld [vmem:[%s1908_s0 + $0x98] sm:$0xff] }
  0x23   :  { %1998 = vst [vmem:[#allocation24_spill] sm:$0xff] %v1199_v0  ;;  %v1269_v46 = vsel %vm160_vm14, 1.0, %v2004_v51  ;;  %v1274_v45 = vsel %vm161_vm15, 1.0, %v2004_v51  ;;  %v1291_v42 = vpop.eup %815  ;;  %v1294_v35 = vadd.f32 %v1256_v53, %v366_v61  ;;  %v1306_v33 = vunpack.c.2.s8 %v137_v13 }
  0x24   :  { %1999 = vst [vmem:[#allocation25_spill] sm:$0xff] %v1210_v62  ;;  %vm162_vm0 = vcmp.eq.s32.totalorder %v1210_v62, 0  ;;  %vm163_vm1 = vcmp.eq.s32.totalorder %v1212_v63, 0  ;;  %v1313_v61 = vadd.f32 %v1291_v42, %v369_v10  ;;  %819 = vrcp.f32 %v1259_v26 }
  0x25   :  { %2000 = vst [vmem:[#allocation26_spill] sm:$0xff] %v1212_v63  ;;  %v255_v24 = vmax.f32 %v254_v48, %v1247_v27  ;;  %v258_v54 = vmax.f32 %v257_v25, %v1252_v3  ;;  %821 = vrcp.f32 %v1294_v35  ;;  %v260_v10 = vmax.f32 %v1242_v2, %v1284_v30 }
  0x26   :  { %2001 = vst [vmem:[#allocation27_spill] sm:$0xff] %v1219_v14  ;;  %v1324_v14 = vld [vmem:[%s1908_s0 + $0xd8] sm:$0xff]  ;;  %v263_v18 = vmax.f32 %v1279_v58, %v1289_v34  ;;  %823 = vrcp.f32 %v1313_v61  ;;  %v1347_v48 = vunpack.c.3.s8 %v137_v13  ;;  %v1366_v13 = vsel %vm163_vm1, 1.0, %v2004_v51 }
  0x27   :  { %2002 = vst [vmem:[#allocation28_spill] sm:$0xff] %v1223_v44  ;;  %v1310_v44 = vpop.eup %817  ;;  %v1350_v25 = vmax.f32 %v255_v24, %v1299_v38  ;;  %vm164_vm2 = vcmp.eq.s32.totalorder %v1306_v33, 0  ;;  %vm168_vm6 = vcmp.eq.s32.totalorder %v1306_v33, 1  ;;  %vm172_vm10 = vcmp.eq.s32.totalorder %v1306_v33, 2 }
  0x28   :  { %2003 = vst [vmem:[#allocation29_spill] sm:$0xff] %v1232_v28  ;;  %v1304_v28 = vld [vmem:[%s1908_s0 + $0xe8] sm:$0xff]  ;;  %v1329_v21 = vadd.f32 %v1310_v44, %v372_v29  ;;  %v1345_v29 = vld [vmem:[%s1908_s0 + $0xf8] sm:$0xff]  ;;  %vm165_vm3 = vcmp.eq.s32.totalorder %v1347_v48, 0  ;;  %vm169_vm7 = vcmp.eq.s32.totalorder %v1347_v48, 1  ;;  %vm173_vm11 = vcmp.eq.s32.totalorder %v1347_v48, 2 }
  0x29   :  { %2005 = vst [vmem:[#allocation30_spill] sm:$0xff] %v1242_v2  ;;  %v1353_v16 = vmax.f32 %v258_v54, %v1304_v28  ;;  %v282_v24 = vsub.f32 %v1184_v55, %v1350_v25  ;;  %v286_v62 = vsub.f32 %v1189_v56, %v1350_v25  ;;  %vm176_vm14 = vcmp.eq.s32.totalorder %v1306_v33, 3 }
  0x2a   :  { %2007 = vst [vmem:[#allocation32_spill] sm:$0xff] %v1252_v3  ;;  %825 = vrcp.f32 %v1329_v21  ;;  %vm177_vm15 = vcmp.eq.s32.totalorder %v1347_v48, 3 }
  0x2b   :  { %2008 = vst [vmem:[#allocation33_spill] sm:$0xff] %v1259_v26  ;;  %v283_v54 = vsub.f32 %v1199_v0, %v1353_v16  ;;  %v330_v56 = vmul.f32 1.442695, %v282_v24 }
  0x2c   :  { %2009 = vst [vmem:[#allocation34_spill] sm:$0xff] %v1264_v49  ;;  %v264_v49 = vmax.f32 %v263_v18, %v1324_v14 }
  0x2d   :  { %2010 = vst [vmem:[#allocation35_spill] sm:$0xff] %v1269_v46  ;;  %v261_v46 = vmax.f32 %v260_v10, %v1319_v32  ;;  %827 = vpow2.f32 %v330_v56 }
  0x2e   :  { %2011 = vst [vmem:[#allocation36_spill] sm:$0xff] %v1274_v45  ;;  %v1359_v45 = vsel %vm162_vm0, 1.0, %v2004_v51  ;;  %v1378_v10 = vmax.f32 %v264_v49, %v1345_v29 }
  0x2f   :  { %2012 = vst [vmem:[#allocation37_spill] sm:$0xff] %v1279_v58 }
  0x30   :  { %2013 = vst [vmem:[#allocation38_spill] sm:$0xff] %v1289_v34  ;;  %v285_v63 = vsub.f32 %v1279_v58, %v1378_v10 }
  0x31   :  { %2014 = vst [vmem:[#allocation39_spill] sm:$0xff] %v1294_v35 }
  0x32   :  { %2015 = vst [vmem:[#allocation40_spill] sm:$0xff] %v1299_v38 }
  0x33   :  { %2016 = vst [vmem:[#allocation41_spill] sm:$0xff] %v1304_v28 }
  0x34   :  { %2017 = vst [vmem:[#allocation42_spill] sm:$0xff] %v1313_v61 }
  0x35   :  { %2018 = vst [vmem:[#allocation43_spill] sm:$0xff] %v1319_v32 }
  0x36   :  { %2019 = vst [vmem:[#allocation44_spill] sm:$0xff] %v1324_v14 }
  0x37   :  { %2020 = vst [vmem:[#allocation45_spill] sm:$0xff] %v1329_v21 }
  0x38   :  { %2022 = vst [vmem:[#allocation47_spill] sm:$0xff] %v1345_v29  ;;  %v332_v29 = vmul.f32 1.442695, %v283_v54 }
  0x39   :  { %2023 = vst [vmem:[#allocation48_spill] sm:$0xff] %v1350_v25  ;;  %v336_v25 = vmul.f32 1.442695, %v285_v63 }
  0x3a   :  { %2024 = vst [vmem:[#allocation49_spill] sm:$0xff] %v1353_v16  ;;  %829 = vpow2.f32 %v332_v29 }
  0x3b   :  { %2025 = vst [vmem:[#allocation50_spill] sm:$0xff] %v1359_v45  ;;  %v1375_v45 = vmax.f32 %v261_v46, %v1340_v17 }
  0x3c   :  { %2026 = vst [vmem:[#allocation51_spill] sm:$0xff] %v1366_v13  ;;  %v820_v13 = vpop.eup %819 }
  0x3d   :  { %2027 = vst [vmem:[#allocation52_spill] sm:$0xff] %v1375_v45  ;;  %v822_v51 = vpop.eup %821  ;;  %v394_v49 = vmul.f32 %v820_v13, %v1259_v26  ;;  %v284_v18 = vsub.f32 %v1242_v2, %v1375_v45 }
  0x3e   :  { %2028 = vst [vmem:[#allocation53_spill] sm:$0xff] %v1378_v10  ;;  %v824_v27 = vpop.eup %823  ;;  %v395_v55 = vmul.f32 %v822_v51, %v1294_v35 }
  0x3f   :  { %v826_v26 = vpop.eup %825  ;;  %v396_v28 = vmul.f32 %v824_v27, %v1313_v61  ;;  %v402_v2 = vsub.f32 2.0, %v394_v49  ;;  %v334_v0 = vmul.f32 1.442695, %v284_v18  ;;  %v338_v61 = vmul.f32 1.442695, %v286_v62 }
  0x40   :  { %v397_v35 = vmul.f32 %v826_v26, %v1329_v21  ;;  %v403_v38 = vsub.f32 2.0, %v395_v55 }
  0x41   :  { %v404_v3 = vsub.f32 2.0, %v396_v28  ;;  %v410_v46 = vmul.f32 %v820_v13, %v402_v2  ;;  %831 = vpow2.f32 %v334_v0 }
  0x42   :  { %v405_v24 = vsub.f32 2.0, %v397_v35  ;;  %v411_v32 = vmul.f32 %v822_v51, %v403_v38  ;;  %833 = vpow2.f32 %v336_v25 }
  0x43   :  { %v412_v49 = vmul.f32 %v824_v27, %v404_v3  ;;  %v1409_v34 = vmul.f32 %v1078_v20, %v410_v46  ;;  %v1412_v58 = vmul.f32 %v1118_v7, %v410_v46  ;;  %v1415_v54 = vmul.f32 %v1172_v52, %v410_v46 }
  0x44   :  { %v413_v55 = vmul.f32 %v826_v26, %v405_v24  ;;  %v1418_v28 = vmul.f32 %v1090_v31, %v411_v32  ;;  %v1421_v56 = vmul.f32 %v1130_v43, %v411_v32  ;;  %v1424_v38 = vmul.f32 %v1191_v57, %v411_v32  ;;  %v1436_v31 = vpop.eup %827 }
  0x45   :  { %v1427_v27 = vmul.f32 %v1104_v39, %v412_v49  ;;  %v538_v20 = vmul.f32 %v1037_v37, %v1409_v34  ;;  %v1432_v7 = vmul.f32 %v1142_v47, %v412_v49  ;;  %v542_v26 = vmul.f32 %v1073_v15, %v1412_v58  ;;  %v1449_v47 = vpop.eup %829 }
  0x46   :  { %v1439_v43 = vmul.f32 %v1109_v4, %v413_v55  ;;  %v539_v52 = vmul.f32 %v1147_v8, %v1418_v28  ;;  %v1444_v39 = vmul.f32 %v1155_v11, %v413_v55  ;;  %v543_v57 = vmul.f32 %v1076_v19, %v1421_v56 }
  0x47   :  { %v540_v0 = vmul.f32 %v1160_v12, %v1427_v27  ;;  %v544_v4 = vmul.f32 %v1081_v22, %v1432_v7  ;;  %v1456_v62 = vmul.f32 %v1206_v60, %v412_v49  ;;  %v1459_v63 = vmul.f32 %v1214_v9, %v413_v55  ;;  %v1461_v11 = vpop.eup %831 }
  0x48   :  { %v541_v51 = vmul.f32 %v1165_v50, %v1439_v43  ;;  %v578_v2 = vadd.f32 %v539_v52, %v538_v20  ;;  %v545_v3 = vmul.f32 %v1084_v23, %v1444_v39  ;;  %v579_v35 = vadd.f32 %v543_v57, %v542_v26 }
  0x49   :  { %v546_v29 = vmul.f32 %v1113_v5, %v1415_v54  ;;  %v547_v60 = vmul.f32 %v1116_v6, %v1424_v38  ;;  %v548_v9 = vmul.f32 %v1121_v40, %v1456_v62  ;;  %v549_v13 = vmul.f32 %v1124_v41, %v1459_v63  ;;  %v2060_v41 = vld [vmem:[#allocation26_spill] sm:$0xff] }
  0x4a   :  { %v586_v18 = vadd.f32 %v578_v2, %v540_v0  ;;  %v587_v24 = vadd.f32 %v579_v35, %v544_v4  ;;  %v1477_v20 = vmul.f32 %v1227_v36, %v410_v46  ;;  %v1480_v26 = vmul.f32 %v1256_v53, %v411_v32  ;;  %v2029_v4 = vld [vmem:[#allocation34_spill] sm:$0xff]  ;;  %v2030_v32 = vld [vmem:[#allocation35_spill] sm:$0xff]  ;;  %v2031_v2 = vld [vmem:[#allocation36_spill] sm:$0xff] }
  0x4b   :  { %v580_v52 = vadd.f32 %v547_v60, %v546_v29  ;;  %v1483_v57 = vmul.f32 %v1291_v42, %v412_v49  ;;  %v1486_v21 = vmul.f32 %v1310_v44, %v413_v55  ;;  %835 = vpow2.f32 %v338_v61  ;;  %v2034_v35 = vld [vmem:[#allocation38_spill] sm:$0xff] }
  0x4c   :  { %v594_v23 = vadd.f32 %v586_v18, %v541_v51  ;;  %v595_v50 = vadd.f32 %v587_v24, %v545_v3  ;;  %v550_v0 = vmul.f32 %v1237_v1, %v1477_v20  ;;  %v551_v36 = vmul.f32 %v2029_v4, %v1480_v26  ;;  %v2037_v18 = vld [vmem:[#allocation48_spill] sm:$0xff] }
  0x4d   :  { %v588_v46 = vadd.f32 %v580_v52, %v548_v9  ;;  %v552_v53 = vmul.f32 %v2030_v32, %v1483_v57  ;;  %v553_v42 = vmul.f32 %v2031_v2, %v1486_v21  ;;  %v2032_v44 = vsub.f32 %v1204_v59, %v1353_v16  ;;  %v2036_v9 = vld [vmem:[#allocation31_spill] sm:$0xff] }
  0x4e   :  { %v581_v49 = vadd.f32 %v551_v36, %v550_v0  ;;  %v2033_v51 = vsub.f32 %v1284_v30, %v1375_v45  ;;  %v2035_v29 = vsub.f32 %v2034_v35, %v1378_v10  ;;  %v2038_v24 = vsub.f32 %v2036_v9, %v2037_v18  ;;  %610 = vst [vmem:[%s1910_s2] sm:$0xff] %v594_v23  ;;  %v2039_v0 = vld [vmem:[#allocation47_spill] sm:$0xff]  ;;  %v2040_v36 = vld [vmem:[#allocation32_spill] sm:$0xff] }
  0x4f   :  { %v340_v25 = vmul.f32 1.442695, %v2032_v44  ;;  %v596_v55 = vadd.f32 %v588_v46, %v549_v13  ;;  %v297_v13 = vsub.f32 %v2039_v0, %v1378_v10  ;;  %v2041_v46 = vsub.f32 %v2040_v36, %v1353_v16  ;;  %611 = vst [vmem:[%s1910_s2 + $0x8] sm:$0xff] %v595_v50  ;;  %v2044_v23 = vld [vmem:[#allocation43_spill] sm:$0xff]  ;;  %v2047_v36 = vld [vmem:[#allocation40_spill] sm:$0xff] }
  0x50   :  { %v342_v3 = vmul.f32 1.442695, %v2033_v51  ;;  %v344_v60 = vmul.f32 1.442695, %v2035_v29  ;;  %v346_v52 = vmul.f32 1.442695, %v2038_v24  ;;  %v589_v61 = vadd.f32 %v581_v49, %v552_v53  ;;  %v1516_v51 = vpop.eup %833 }
  0x51   :  { %837 = vpow2.f32 %v340_v25  ;;  %v348_v44 = vmul.f32 1.442695, %v2041_v46  ;;  %v2042_v29 = vmov 0.0   ;;  %v2045_v53 = vsub.f32 %v2044_v23, %v1375_v45  ;;  %v1535_v32 = vpop.eup %835  ;;  %612 = vst [vmem:[%s1910_s2 + $0x10] sm:$0xff] %v596_v55  ;;  %v2056_v55 = vld [vmem:[#allocation24_spill] sm:$0xff] }
  0x52   :  { %v1524_v24 = vsel %vm164_vm2, 1.0, %v2042_v29  ;;  %839 = vpow2.f32 %v342_v3  ;;  %v597_v25 = vadd.f32 %v589_v61, %v553_v42  ;;  %v2046_v46 = vsub.f32 %v1324_v14, %v1378_v10  ;;  %v2050_v42 = vld [vmem:[#allocation41_spill] sm:$0xff]  ;;  %v2053_v10 = vld [vmem:[#allocation22_spill] sm:$0xff]  ;;  %v2057_v14 = vld [vmem:[#allocation51_spill] sm:$0xff] }
  0x53   :  { %2043 = vst [vmem:[#allocation34_spill] sm:$0xff] %v1524_v24  ;;  %v350_v49 = vmul.f32 1.442695, %v2045_v53  ;;  %841 = vpow2.f32 %v344_v60  ;;  %v2048_v2 = vsub.f32 %v2047_v36, %v2037_v18  ;;  %v1543_v3 = vsel %vm165_vm3, 1.0, %v2042_v29  ;;  %v2054_v18 = vld [vmem:[#allocation50_spill] sm:$0xff] }
  0x54   :  { %v352_v0 = vmul.f32 1.442695, %v2046_v46  ;;  %2049 = vst [vmem:[#allocation38_spill] sm:$0xff] %v1543_v3  ;;  %843 = vpow2.f32 %v346_v52  ;;  %v2051_v60 = vsub.f32 %v2050_v42, %v1353_v16  ;;  %v2052_v53 = vsub.f32 %v1340_v17, %v1375_v45  ;;  %v2059_v52 = vld [vmem:[#allocation25_spill] sm:$0xff] }
  0x55   :  { %v354_v50 = vmul.f32 1.442695, %v2048_v2  ;;  %845 = vpow2.f32 %v348_v44  ;;  %v360_v46 = vmul.f32 1.442695, %v297_v13  ;;  %v1553_v36 = vmul.f32 %v2054_v18, %v2053_v10  ;;  %613 = vst [vmem:[%s1910_s2 + $0x18] sm:$0xff] %v597_v25  ;;  %v2064_v45 = vld [vmem:[#allocation37_spill] sm:$0xff] }
  0x56   :  { %v356_v61 = vmul.f32 1.442695, %v2051_v60  ;;  %v358_v2 = vmul.f32 1.442695, %v2052_v53  ;;  %847 = vpow2.f32 %v350_v49  ;;  %v1557_v23 = vmul.f32 %v2057_v14, %v2056_v55  ;;  %v2061_v49 = vld [vmem:[#allocation30_spill] sm:$0xff] }
  0x57   :  { %2055 = vst [vmem:[#allocation31_spill] sm:$0xff] %v1553_v36  ;;  %vm166_vm4 = vcmp.eq.s32.totalorder %v2059_v52, 1  ;;  %vm167_vm5 = vcmp.eq.s32.totalorder %v2060_v41, 1  ;;  %v1561_v60 = vpop.eup %837  ;;  %849 = vpow2.f32 %v352_v0  ;;  %v374_v10 = vadd.f32 %v1535_v32, %v1436_v31 }
  0x58   :  { %2058 = vst [vmem:[#allocation22_spill] sm:$0xff] %v1557_v23  ;;  %v1570_v13 = vpop.eup %839  ;;  %851 = vpow2.f32 %v354_v50  ;;  %v377_v44 = vadd.f32 %v1561_v60, %v1449_v47  ;;  %v1576_v53 = vmul.f32 %v1524_v24, %v2061_v49  ;;  %v1579_v25 = vsel %vm166_vm4, 1.0, %v2042_v29 }
  0x59   :  { %v1581_v0 = vpop.eup %841  ;;  %853 = vpow2.f32 %v356_v61  ;;  %v380_v55 = vadd.f32 %v1570_v13, %v1461_v11  ;;  %v1587_v16 = vmul.f32 %v1543_v3, %v2064_v45  ;;  %v1592_v50 = vsel %vm167_vm5, 1.0, %v2042_v29 }
  0x5a   :  { %2062 = vst [vmem:[#allocation50_spill] sm:$0xff] %v1576_v53  ;;  %v1594_v49 = vpop.eup %843  ;;  %855 = vpow2.f32 %v358_v2  ;;  %v383_v17 = vadd.f32 %v1581_v0, %v1516_v51  ;;  %v1599_v61 = vsel %vm168_vm6, 1.0, %v2042_v29  ;;  %v1602_v42 = vsel %vm169_vm7, 1.0, %v2042_v29 }
  0x5b   :  { %2063 = vst [vmem:[#allocation24_spill] sm:$0xff] %v1581_v0  ;;  %v1604_v53 = vpop.eup %845  ;;  %857 = vpow2.f32 %v360_v46  ;;  %v375_v45 = vadd.f32 %v1594_v49, %v374_v10  ;;  %vm170_vm8 = vcmp.eq.s32.totalorder %v2059_v52, 2  ;;  %vm171_vm9 = vcmp.eq.s32.totalorder %v2060_v41, 2 }
  0x5c   :  { %2065 = vst [vmem:[#allocation51_spill] sm:$0xff] %v1587_v16  ;;  %v2066_v16 = vld [vmem:[#allocation23_spill] sm:$0xff]  ;;  %v1612_v2 = vpop.eup %847  ;;  %v378_v36 = vadd.f32 %v1604_v53, %v377_v44  ;;  %v1627_v10 = vmul.f32 %v1599_v61, %v1284_v30  ;;  %v1630_v44 = vsel %vm170_vm8, 1.0, %v2042_v29  ;;  %v1637_v0 = vmul.f32 %v1602_v42, %v2034_v35 }
  0x5d   :  { %v1609_v23 = vmul.f32 %v1579_v25, %v2066_v16  ;;  %v1618_v3 = vpop.eup %849  ;;  %v381_v46 = vadd.f32 %v1612_v2, %v380_v55  ;;  %v1623_v16 = vmul.f32 %v1592_v50, %v1204_v59  ;;  %v1640_v55 = vsel %vm171_vm9, 1.0, %v2042_v29 }
  0x5e   :  { %2069 = vst [vmem:[#allocation30_spill] sm:$0xff] %v1627_v10  ;;  %v384_v24 = vadd.f32 %v1618_v3, %v383_v17  ;;  %v1643_v59 = vsel %vm172_vm10, 1.0, %v2042_v29  ;;  %v1651_v10 = vsel %vm173_vm11, 1.0, %v2042_v29  ;;  %v1655_v17 = vmul.f32 %v1630_v44, %v2036_v9 }
  0x5f   :  { %2067 = vst [vmem:[#allocation25_spill] sm:$0xff] %v1609_v23  ;;  %v1632_v23 = vpop.eup %851  ;;  %vm174_vm12 = vcmp.eq.s32.totalorder %v2059_v52, 3  ;;  %vm175_vm13 = vcmp.eq.s32.totalorder %v2060_v41, 3  ;;  %v1683_v33 = vsel %vm176_vm14, 1.0, %v2042_v29  ;;  %v1686_v41 = vsel %vm177_vm15, 1.0, %v2042_v29 }
  0x60   :  { %2068 = vst [vmem:[#allocation26_spill] sm:$0xff] %v1623_v16  ;;  %v1645_v16 = vpop.eup %853  ;;  %v1648_v30 = vadd.f32 %v1632_v23, %v375_v45  ;;  %v1673_v9 = vsel %vm174_vm12, 1.0, %v2042_v29  ;;  %v1676_v52 = vsel %vm175_vm13, 1.0, %v2042_v29  ;;  %v626_v48 = vadd.f32 %v1418_v28, %v1409_v34 }
  0x61   :  { %2070 = vst [vmem:[#allocation37_spill] sm:$0xff] %v1632_v23  ;;  %v1658_v35 = vpop.eup %855  ;;  %v674_v29 = vadd.f32 %v1147_v8, %v1037_v37  ;;  %v677_v37 = vadd.f32 %v2029_v4, %v1237_v1 }
  0x62   :  { %2071 = vst [vmem:[#allocation23_spill] sm:$0xff] %v1637_v0  ;;  %v1661_v0 = vadd.f32 %v1645_v16, %v378_v36  ;;  %v1666_v45 = vpop.eup %857  ;;  %v1669_v23 = vadd.f32 %v1658_v35, %v381_v46  ;;  %859 = vrcp.f32 %v1648_v30  ;;  %v627_v46 = vadd.f32 %v1421_v56, %v1412_v58 }
  0x63   :  { %2072 = vst [vmem:[#allocation54_spill] sm:$0xff] %v1655_v17  ;;  %v1679_v36 = vadd.f32 %v1666_v45, %v384_v24  ;;  %v628_v24 = vadd.f32 %v1424_v38, %v1415_v54  ;;  %v629_v17 = vadd.f32 %v1480_v26, %v1477_v20  ;;  %v676_v54 = vadd.f32 %v1116_v6, %v1113_v5 }
  0x64   :  { %861 = vrcp.f32 %v1661_v0  ;;  %2073 = vst [vmem:[#allocation55_spill] sm:$0xff] %v1683_v33  ;;  %v634_v33 = vadd.f32 %v626_v48, %v1427_v27  ;;  %v635_v34 = vadd.f32 %v627_v46, %v1432_v7  ;;  %v682_v56 = vadd.f32 %v1160_v12, %v674_v29  ;;  %v2075_v12 = vld [vmem:[#allocation20_spill] sm:$0xff] }
  0x65   :  { %2074 = vst [vmem:[#allocation56_spill] sm:$0xff] %v1686_v41  ;;  %863 = vrcp.f32 %v1669_v23  ;;  %v675_v41 = vadd.f32 %v1076_v19, %v1073_v15  ;;  %v636_v58 = vadd.f32 %v628_v24, %v1456_v62  ;;  %v637_v28 = vadd.f32 %v629_v17, %v1483_v57  ;;  %v2078_v24 = vld [vmem:[#allocation35_spill] sm:$0xff] }
  0x66   :  { %865 = vrcp.f32 %v1679_v36  ;;  %v642_v15 = vadd.f32 %v634_v33, %v1439_v43  ;;  %v643_v19 = vadd.f32 %v635_v34, %v1444_v39  ;;  %v684_v7 = vadd.f32 %v1121_v40, %v676_v54  ;;  %v2077_v40 = vld [vmem:[#allocation15_spill] sm:$0xff] }
  0x67   :  { %v683_v38 = vadd.f32 %v1081_v22, %v675_v41  ;;  %v644_v27 = vadd.f32 %v636_v58, %v1459_v63  ;;  %v645_v6 = vadd.f32 %v637_v28, %v1486_v21  ;;  %v690_v20 = vadd.f32 %v2075_v12, %v682_v56  ;;  %v2076_v22 = vld [vmem:[#allocation10_spill] sm:$0xff] }
  0x68   :  { %v860_v8 = vpop.eup %859  ;;  %658 = vst [vmem:[%s1911_s3] sm:$0xff] %v642_v15  ;;  %v692_v21 = vadd.f32 %v2077_v40, %v684_v7  ;;  %v1731_v29 = vadd.f32 %v2078_v24, %v677_v37  ;;  %v1735_v34 = vadd.f32 %v2057_v14, %v2054_v18  ;;  %v1742_v28 = vadd.f32 %v1592_v50, %v1579_v25 }
  0x69   :  { %v398_v5 = vmul.f32 %v860_v8, %v1648_v30  ;;  %v691_v26 = vadd.f32 %v2076_v22, %v683_v38  ;;  %659 = vst [vmem:[%s1911_s3 + $0x8] sm:$0xff] %v643_v19 }
  0x6a   :  { %v862_v62 = vpop.eup %861  ;;  %660 = vst [vmem:[%s1911_s3 + $0x10] sm:$0xff] %v644_v27 }
  0x6b   :  { %v864_v57 = vpop.eup %863  ;;  %v399_v17 = vmul.f32 %v862_v62, %v1661_v0  ;;  %v406_v39 = vsub.f32 2.0, %v398_v5  ;;  %661 = vst [vmem:[%s1911_s3 + $0x18] sm:$0xff] %v645_v6 }
  0x6c   :  { %v866_v41 = vpop.eup %865  ;;  %v400_v43 = vmul.f32 %v864_v57, %v1669_v23  ;;  %706 = vst [vmem:[%s1912_s4] sm:$0xff] %v690_v20  ;;  %v2081_v20 = vld [vmem:[#allocation38_spill] sm:$0xff] }
  0x6d   :  { %v401_v63 = vmul.f32 %v866_v41, %v1679_v36  ;;  %v407_v33 = vsub.f32 2.0, %v399_v17  ;;  %v414_v46 = vmul.f32 %v860_v8, %v406_v39  ;;  %707 = vst [vmem:[%s1912_s4 + $0x8] sm:$0xff] %v691_v26 }
  0x6e   :  { %v408_v48 = vsub.f32 2.0, %v400_v43  ;;  %708 = vst [vmem:[%s1912_s4 + $0x10] sm:$0xff] %v692_v21 }
  0x6f   :  { %v409_v58 = vsub.f32 2.0, %v401_v63  ;;  %v415_v54 = vmul.f32 %v862_v62, %v407_v33  ;;  %v434_v38 = vmul.f32 %v1436_v31, %v414_v46  ;;  %v438_v37 = vmul.f32 %v1535_v32, %v414_v46  ;;  %v2082_v63 = vld [vmem:[#allocation37_spill] sm:$0xff] }
  0x70   :  { %v416_v56 = vmul.f32 %v864_v57, %v408_v48  ;;  %v442_v8 = vmul.f32 %v1594_v49, %v414_v46 }
  0x71   :  { %v417_v15 = vmul.f32 %v866_v41, %v409_v58  ;;  %v435_v19 = vmul.f32 %v1449_v47, %v415_v54  ;;  %v439_v27 = vmul.f32 %v1561_v60, %v415_v54  ;;  %v443_v7 = vmul.f32 %v1604_v53, %v415_v54  ;;  %v2079_v53 = vld [vmem:[#allocation24_spill] sm:$0xff] }
  0x72   :  { %v436_v31 = vmul.f32 %v1461_v11, %v416_v56  ;;  %v554_v32 = vmul.f32 %v2054_v18, %v434_v38  ;;  %v440_v49 = vmul.f32 %v1570_v13, %v416_v56  ;;  %v558_v62 = vmul.f32 %v1579_v25, %v438_v37  ;;  %v2080_v11 = vld [vmem:[#allocation34_spill] sm:$0xff] }
  0x73   :  { %v437_v47 = vmul.f32 %v1516_v51, %v417_v15  ;;  %v555_v60 = vmul.f32 %v2057_v14, %v435_v19  ;;  %v441_v5 = vmul.f32 %v2079_v53, %v417_v15  ;;  %v559_v6 = vmul.f32 %v1592_v50, %v439_v27 }
  0x74   :  { %v556_v18 = vmul.f32 %v2080_v11, %v436_v31  ;;  %v560_v13 = vmul.f32 %v1599_v61, %v440_v49  ;;  %v444_v25 = vmul.f32 %v1612_v2, %v416_v56  ;;  %v445_v12 = vmul.f32 %v1618_v3, %v417_v15 }
  0x75   :  { %v557_v51 = vmul.f32 %v2081_v20, %v437_v47  ;;  %v582_v22 = vadd.f32 %v555_v60, %v554_v32  ;;  %v561_v14 = vmul.f32 %v1602_v42, %v441_v5  ;;  %v583_v26 = vadd.f32 %v559_v6, %v558_v62  ;;  %v2083_v6 = vld [vmem:[#allocation55_spill] sm:$0xff] }
  0x76   :  { %v562_v50 = vmul.f32 %v1630_v44, %v442_v8  ;;  %v563_v57 = vmul.f32 %v1640_v55, %v443_v7  ;;  %v564_v17 = vmul.f32 %v1643_v59, %v444_v25  ;;  %v565_v41 = vmul.f32 %v1651_v10, %v445_v12 }
  0x77   :  { %v590_v43 = vadd.f32 %v582_v22, %v556_v18  ;;  %v591_v39 = vadd.f32 %v583_v26, %v560_v13  ;;  %v446_v2 = vmul.f32 %v2082_v63, %v414_v46  ;;  %v447_v3 = vmul.f32 %v1645_v16, %v415_v54  ;;  %v2084_v13 = vld [vmem:[#allocation56_spill] sm:$0xff] }
  0x78   :  { %v584_v33 = vadd.f32 %v563_v57, %v562_v50  ;;  %v448_v40 = vmul.f32 %v1658_v35, %v416_v56  ;;  %v449_v21 = vmul.f32 %v1666_v45, %v417_v15  ;;  %v630_v48 = vadd.f32 %v435_v19, %v434_v38  ;;  %v2085_v15 = vld [vmem:[#allocation36_spill] sm:$0xff] }
  0x79   :  { %v598_v58 = vadd.f32 %v590_v43, %v557_v51  ;;  %v599_v32 = vadd.f32 %v591_v39, %v561_v14  ;;  %v566_v62 = vmul.f32 %v1673_v9, %v446_v2  ;;  %v567_v60 = vmul.f32 %v1676_v52, %v447_v3  ;;  %v2088_v14 = vld [vmem:[#allocation4_spill] sm:$0xff]  ;;  %v2090_v43 = vld [vmem:[#allocation21_spill] sm:$0xff]  ;;  %v2091_v39 = vld [vmem:[#allocation11_spill] sm:$0xff] }
  0x7a   :  { %v592_v53 = vadd.f32 %v584_v33, %v564_v17  ;;  %v568_v18 = vmul.f32 %v2083_v6, %v448_v40  ;;  %v569_v22 = vmul.f32 %v2084_v13, %v449_v21  ;;  %v638_v46 = vadd.f32 %v630_v48, %v436_v31  ;;  %v2089_v17 = vld [vmem:[#allocation5_spill] sm:$0xff]  ;;  %v2097_v48 = vld [vmem:[#allocation14_spill] sm:$0xff] }
  0x7b   :  { %v585_v26 = vadd.f32 %v567_v60, %v566_v62  ;;  %v631_v16 = vadd.f32 %v439_v27, %v438_v37  ;;  %v632_v35 = vadd.f32 %v443_v7, %v442_v8  ;;  %v633_v56 = vadd.f32 %v447_v3, %v446_v2  ;;  %614 = vst [vmem:[%s1910_s2 + $0x20] sm:$0xff] %v598_v58  ;;  %v2094_v3 = vld [vmem:[#allocation28_spill] sm:$0xff]  ;;  %v2095_v33 = vld [vmem:[#allocation13_spill] sm:$0xff] }
  0x7c   :  { %v600_v54 = vadd.f32 %v592_v53, %v565_v41  ;;  %v646_v50 = vadd.f32 %v638_v46, %v437_v47  ;;  %v693_v19 = vadd.f32 %v2085_v15, %v1731_v29  ;;  %v686_v51 = vadd.f32 %v2080_v11, %v1735_v34  ;;  %615 = vst [vmem:[%s1910_s2 + $0x28] sm:$0xff] %v599_v32  ;;  %v2098_v32 = vld [vmem:[#allocation32_spill] sm:$0xff] }
  0x7d   :  { %v593_v45 = vadd.f32 %v585_v26, %v568_v18  ;;  %v639_v38 = vadd.f32 %v631_v16, %v440_v49  ;;  %v640_v37 = vadd.f32 %v632_v35, %v444_v25  ;;  %v641_v27 = vadd.f32 %v633_v56, %v448_v40  ;;  %v2099_v60 = vld [vmem:[#allocation16_spill] sm:$0xff]  ;;  %v2100_v18 = vld [vmem:[#allocation33_spill] sm:$0xff]  ;;  %v2102_v26 = vld [vmem:[#allocation18_spill] sm:$0xff] }
  0x7e   :  { %v694_v31 = vadd.f32 %v2081_v20, %v686_v51  ;;  %616 = vst [vmem:[%s1910_s2 + $0x30] sm:$0xff] %v600_v54  ;;  %v687_v29 = vadd.f32 %v1599_v61, %v1742_v28  ;;  %v680_v34 = vadd.f32 %v1640_v55, %v1630_v44  ;;  %v2086_v44 = vld [vmem:[#allocation2_spill] sm:$0xff]  ;;  %v464_v57 = vmul.f32 %v2078_v24, %v2088_v14  ;;  %v2093_v24 = vld [vmem:[#allocation12_spill] sm:$0xff]  ;;  %v2103_v54 = vld [vmem:[#allocation19_spill] sm:$0xff] }
  0x7f   :  { %v601_v8 = vadd.f32 %v593_v45, %v569_v22  ;;  %v647_v7 = vadd.f32 %v639_v38, %v441_v5  ;;  %v648_v49 = vadd.f32 %v640_v37, %v445_v12  ;;  %v649_v47 = vadd.f32 %v641_v27, %v449_v21  ;;  %662 = vst [vmem:[%s1911_s3 + $0x20] sm:$0xff] %v646_v50  ;;  %v2087_v12 = vld [vmem:[#allocation3_spill] sm:$0xff]  ;;  %v2096_v21 = vld [vmem:[#allocation29_spill] sm:$0xff]  ;;  %v2105_v56 = vld [vmem:[#allocation44_spill] sm:$0xff] }
  0x80   :  { %v681_v5 = vadd.f32 %v1676_v52, %v1673_v9  ;;  %709 = vst [vmem:[%s1912_s4 + $0x18] sm:$0xff] %v693_v19  ;;  %v695_v11 = vadd.f32 %v1602_v42, %v687_v29  ;;  %v688_v25 = vadd.f32 %v1643_v59, %v680_v34  ;;  %v462_v28 = vmul.f32 %v1237_v1, %v2086_v44  ;;  %v2101_v22 = vld [vmem:[#allocation17_spill] sm:$0xff]  ;;  %v2104_v35 = vld [vmem:[#allocation43_spill] sm:$0xff]  ;;  %v2107_v27 = vld [vmem:[#allocation42_spill] sm:$0xff] }
  0x81   :  { %617 = vst [vmem:[%s1910_s2 + $0x38] sm:$0xff] %v601_v8  ;;  %v463_v20 = vmul.f32 %v2029_v4, %v2087_v12  ;;  %v465_v41 = vmul.f32 %v2085_v15, %v2089_v17  ;;  %v482_v63 = vadd.f32 %v2091_v39, %v2090_v43  ;;  %v2092_v4 = vld [vmem:[#allocation27_spill] sm:$0xff]  ;;  %v488_v40 = vadd.f32 %v2095_v33, %v2094_v3  ;;  %v2110_v8 = vld [vmem:[#allocation25_spill] sm:$0xff]  ;;  %v2113_v29 = vld [vmem:[#allocation50_spill] sm:$0xff] }
  0x82   :  { %v689_v61 = vadd.f32 %v2083_v6, %v681_v5  ;;  %663 = vst [vmem:[%s1911_s3 + $0x28] sm:$0xff] %v647_v7  ;;  %v696_v42 = vadd.f32 %v1651_v10, %v688_v25  ;;  %v485_v2 = vadd.f32 %v2093_v24, %v2092_v4  ;;  %v491_v58 = vadd.f32 %v2097_v48, %v2096_v21  ;;  %v2106_v15 = vld [vmem:[#allocation39_spill] sm:$0xff]  ;;  %v2114_v34 = vld [vmem:[#allocation30_spill] sm:$0xff]  ;;  %v2119_v39 = vld [vmem:[#allocation41_spill] sm:$0xff] }
  0x83   :  { %664 = vst [vmem:[%s1911_s3 + $0x30] sm:$0xff] %v648_v49  ;;  %v475_v62 = vmul.f32 %v1640_v55, %v2098_v32  ;;  %v483_v53 = vadd.f32 %v482_v63, %v2099_v60  ;;  %867 = vlog2.f32 %v2100_v18  ;;  %v489_v16 = vadd.f32 %v488_v40, %v2102_v26  ;;  %v2112_v49 = vld [vmem:[#allocation26_spill] sm:$0xff]  ;;  %v2116_v25 = vld [vmem:[#allocation23_spill] sm:$0xff] }
  0x84   :  { %v697_v1 = vadd.f32 %v2084_v13, %v689_v61  ;;  %665 = vst [vmem:[%s1911_s3 + $0x38] sm:$0xff] %v649_v47  ;;  %v486_v46 = vadd.f32 %v485_v2, %v2101_v22  ;;  %v492_v50 = vadd.f32 %v491_v58, %v2103_v54  ;;  %v476_v55 = vmul.f32 %v1643_v59, %v2104_v35  ;;  %v2109_v59 = vld [vmem:[#allocation31_spill] sm:$0xff]  ;;  %v2120_v4 = vld [vmem:[#allocation6_spill] sm:$0xff] }
  0x85   :  { %710 = vst [vmem:[%s1912_s4 + $0x20] sm:$0xff] %v694_v31  ;;  %v477_v45 = vmul.f32 %v1651_v10, %v2105_v56  ;;  %v484_v38 = vadd.f32 %v483_v53, %v462_v28  ;;  %869 = vlog2.f32 %v2106_v15  ;;  %v490_v51 = vadd.f32 %v489_v16, %v464_v57  ;;  %v2108_v10 = vld [vmem:[#allocation45_spill] sm:$0xff]  ;;  %v2111_v31 = vld [vmem:[#allocation22_spill] sm:$0xff]  ;;  %v2122_v40 = vld [vmem:[#allocation47_spill] sm:$0xff] }
  0x86   :  { %711 = vst [vmem:[%s1912_s4 + $0x28] sm:$0xff] %v695_v11  ;;  %v487_v19 = vadd.f32 %v486_v46, %v463_v20  ;;  %v493_v37 = vadd.f32 %v492_v50, %v465_v41  ;;  %871 = vlog2.f32 %v2107_v27  ;;  %v494_v7 = vadd.f32 %v2110_v8, %v2109_v59  ;;  %v2115_v11 = vld [vmem:[#allocation51_spill] sm:$0xff]  ;;  %v2117_v28 = vld [vmem:[#allocation54_spill] sm:$0xff]  ;;  %v2118_v41 = vld [vmem:[#allocation40_spill] sm:$0xff] }
  0x87   :  { %712 = vst [vmem:[%s1912_s4 + $0x30] sm:$0xff] %v696_v42  ;;  %873 = vlog2.f32 %v2108_v10  ;;  %v497_v47 = vadd.f32 %v2112_v49, %v2111_v31  ;;  %v500_v5 = vadd.f32 %v2114_v34, %v2113_v29  ;;  %v503_v61 = vadd.f32 %v2116_v25, %v2115_v11  ;;  %v2121_v2 = vld [vmem:[#allocation46_spill] sm:$0xff]  ;;  %v2125_v46 = vld [vmem:[#allocation9_spill] sm:$0xff]  ;;  %v2126_v56 = vld [vmem:[#allocation48_spill] sm:$0xff] }
  0x88   :  { %713 = vst [vmem:[%s1912_s4 + $0x38] sm:$0xff] %v697_v1  ;;  %875 = vlog2.f32 %v1648_v30  ;;  %v495_v12 = vadd.f32 %v494_v7, %v2117_v28  ;;  %v478_v43 = vmul.f32 %v1673_v9, %v2118_v41  ;;  %v479_v63 = vmul.f32 %v1676_v52, %v2119_v39  ;;  %v2123_v9 = vld [vmem:[#allocation7_spill] sm:$0xff]  ;;  %v2127_v10 = vld [vmem:[#allocation49_spill] sm:$0xff]  ;;  %v2128_v8 = vld [vmem:[#allocation52_spill] sm:$0xff] }
  0x89   :  { %v868_v44 = vpop.eup %867  ;;  %v498_v20 = vadd.f32 %v497_v47, %v475_v62  ;;  %877 = vlog2.f32 %v1661_v0  ;;  %v501_v57 = vadd.f32 %v500_v5, %v476_v55  ;;  %v504_v42 = vadd.f32 %v503_v61, %v477_v45  ;;  %v2124_v62 = vld [vmem:[#allocation8_spill] sm:$0xff]  ;;  %v2129_v47 = vld [vmem:[#allocation53_spill] sm:$0xff] }
  0x8a   :  { %v507_v14 = vmul.f32 0.6931472, %v868_v44  ;;  %879 = vlog2.f32 %v1669_v23  ;;  %v480_v0 = vmul.f32 %v2083_v6, %v2121_v2  ;;  %v481_v23 = vmul.f32 %v2084_v13, %v2122_v40 }
  0x8b   :  { %v870_v17 = vpop.eup %869  ;;  %881 = vlog2.f32 %v1679_v36  ;;  %v496_v60 = vadd.f32 %v495_v12, %v478_v43  ;;  %v499_v53 = vadd.f32 %v498_v20, %v479_v63 }
  0x8c   :  { %v872_v30 = vpop.eup %871  ;;  %v509_v1 = vmul.f32 0.6931472, %v870_v17  ;;  %v522_v24 = vadd.f32 %v507_v14, %v2120_v4  ;;  %v502_v16 = vadd.f32 %v501_v57, %v480_v0  ;;  %v505_v13 = vadd.f32 %v504_v42, %v481_v23 }
  0x8d   :  { %v874_v3 = vpop.eup %873  ;;  %v511_v33 = vmul.f32 0.6931472, %v872_v30 }
  0x8e   :  { %v876_v21 = vpop.eup %875  ;;  %v513_v48 = vmul.f32 0.6931472, %v874_v3  ;;  %v523_v58 = vadd.f32 %v509_v1, %v2123_v9  ;;  %v530_v32 = vsub.f32 %v522_v24, %v484_v38 }
  0x8f   :  { %v878_v52 = vpop.eup %877  ;;  %v524_v36 = vadd.f32 %v511_v33, %v2124_v62  ;;  %v515_v18 = vmul.f32 0.6931472, %v876_v21 }
  0x90   :  { %v880_v22 = vpop.eup %879  ;;  %v525_v26 = vadd.f32 %v513_v48, %v2125_v46  ;;  %v531_v6 = vsub.f32 %v523_v58, %v487_v19  ;;  %v517_v54 = vmul.f32 0.6931472, %v878_v52 }
  0x91   :  { %v882_v50 = vpop.eup %881  ;;  %v532_v35 = vsub.f32 %v524_v36, %v490_v51  ;;  %v519_v55 = vmul.f32 0.6931472, %v880_v22  ;;  %v526_v45 = vadd.f32 %v515_v18, %v2126_v56 }
  0x92   :  { %v533_v15 = vsub.f32 %v525_v26, %v493_v37  ;;  %v716_v38 = vadd.f32 %v531_v6, %v530_v32  ;;  %v521_v27 = vmul.f32 0.6931472, %v882_v50  ;;  %v527_v59 = vadd.f32 %v517_v54, %v2127_v10 }
  0x93   :  { %v528_v7 = vadd.f32 %v519_v55, %v2128_v8  ;;  %v534_v31 = vsub.f32 %v526_v45, %v496_v60 }
  0x94   :  { %v718_v49 = vadd.f32 %v716_v38, %v532_v35  ;;  %v529_v29 = vadd.f32 %v521_v27, %v2129_v47  ;;  %v535_v19 = vsub.f32 %v527_v59, %v499_v53 }
  0x95   :  { %v536_v34 = vsub.f32 %v528_v7, %v502_v16 }
  0x96   :  { %v720_v5 = vadd.f32 %v718_v49, %v533_v15  ;;  %v537_v11 = vsub.f32 %v529_v29, %v505_v13  ;;  %v717_v51 = vadd.f32 %v535_v19, %v534_v31 }
  0x98   :  { %v719_v25 = vadd.f32 %v717_v51, %v536_v34  ;;  %724 = vst [vmem:[%s1913_s5] sm:$0xff] %v720_v5 }
  0x9a   :  { %v721_v37 = vadd.f32 %v719_v25, %v537_v11 }
  0x9c   :  { %725 = vst [vmem:[%s1913_s5 + $0x8] sm:$0xff] %v721_v37 }

</bundles_post_ra>
